<compile_context>
chip_gen: v7x
topology: tpu7x:2x2x1
jax: 0.10.0
libtpu: 0.0.40
codegen_flags: <defaults>
</compile_context>

<pallas_src>
import jax
import jax.numpy as jnp
from jax.experimental import pallas as pl
from jax.experimental.pallas import tpu as pltpu

_VMEM_LIMIT = 32 * 1024 * 1024


# ---------------------------------------------------------------------------
# Bilinear interpolation (PyTorch align_corners=False) as per-axis matrices
# ---------------------------------------------------------------------------
def _bilinear_axis_matrix(out_size: int, in_size: int) -> jnp.ndarray:
    scale = in_size / out_size
    dst = jnp.arange(out_size, dtype=jnp.float32)
    src = jnp.maximum((dst + 0.5) * scale - 0.5, 0.0)
    i0 = jnp.floor(src).astype(jnp.int32)
    i1 = jnp.minimum(i0 + 1, in_size - 1)
    lam = src - i0.astype(jnp.float32)
    m = jnp.zeros((out_size, in_size), jnp.float32)
    rows = jnp.arange(out_size)
    m = m.at[rows, i0].add(1.0 - lam)
    m = m.at[rows, i1].add(lam)
    return m


def _choose_row_tile(h_out: int) -> int:
    """Largest multiple-of-8 divisor of h_out (<=256) that gives >=2 tiles."""
    fallback = h_out
    start = min(h_out, 256)
    start -= start % 8
    for t in range(start, 7, -8):
        if h_out % t == 0:
            if h_out // t >= 2:
                return t
            fallback = t
    return fallback


# ---------------------------------------------------------------------------
# Kernel 1: per-batch channel math (layout: channels x pixels, pixels on lanes)
# ---------------------------------------------------------------------------
def _head_channels_kernel(high_ref, low_ref, w_cbr_ref, bn_b_ref, w_scale_ref,
                          w_hc_ref, w_lc_ref, b_ref, yh_ref, yl_ref):
    high = high_ref[...]                                              # (Ch, Ph) bf16

    # cbr: 1x1 conv (BN scale folded into weight) + BN bias + ReLU (f32 tail).
    t = jnp.dot(w_cbr_ref[...], high, preferred_element_type=jnp.float32)
    t = jnp.maximum(t + bn_b_ref[...], 0.0)                           # (Ci, Ph)

    # scale: AdaptiveAvgPool2d(1) + 1x1 conv + Sigmoid.
    pooled = jnp.mean(high.astype(jnp.float32), axis=1, keepdims=True)  # (Ch, 1)
    logit = jnp.dot(w_scale_ref[...], pooled.astype(jnp.bfloat16),
                    preferred_element_type=jnp.float32)               # (Ci, 1)
    s = 1.0 / (1.0 + jnp.exp(-logit))

    x = (t * s).astype(jnp.bfloat16)                                  # (Ci, Ph)

    # Classify BEFORE upsampling (K << Ci); biases go on the low path since
    # bilinear interpolation rows sum to 1 (bias commutes with interpolation).
    yh_ref[...] = jnp.dot(w_hc_ref[...], x,
                          preferred_element_type=jnp.float32).astype(yh_ref.dtype)
    yl_ref[...] = (jnp.dot(w_lc_ref[...], low_ref[...],
                           preferred_element_type=jnp.float32)
                   + b_ref[...]).astype(yl_ref.dtype)


# ---------------------------------------------------------------------------
# Kernel 2: hi->lo separable upsample of the classified high path, add the
# low path, and apply the W-axis half of the final upsample.
# ---------------------------------------------------------------------------
def _head_spatial_kernel(yh_ref, yl_ref, aw_ref, ah_ref, bw_ref, tmp_ref):
    k_cls, h_lo, _ = tmp_ref.shape
    h_hi = ah_ref.shape[1]
    # W-axis hi->lo for all classes at once: (K*Hh, Wh) @ (Wh, Wl).
    u = jnp.dot(yh_ref[...], aw_ref[...], preferred_element_type=jnp.float32)
    yl = yl_ref[...]                                                  # (K*Hl, Wl) f32
    for k in range(k_cls):
        uk = u[k * h_hi:(k + 1) * h_hi, :].astype(jnp.bfloat16)       # (Hh, Wl)
        v = jnp.dot(ah_ref[...], uk, preferred_element_type=jnp.float32)  # (Hl, Wl)
        logit = v + yl[k * h_lo:(k + 1) * h_lo, :]                    # (Hl, Wl)
        tmp_ref[k, ...] = jnp.dot(logit.astype(jnp.bfloat16), bw_ref[...],
                                  preferred_element_type=jnp.float32
                                  ).astype(tmp_ref.dtype)             # (Hl, Wout)


# ---------------------------------------------------------------------------
# Kernel 3: final H-axis upsample, tiled over output rows (parallel grid axis)
# ---------------------------------------------------------------------------
def _upsample_rows_kernel(bh_ref, tmp_ref, out_ref):
    bh = bh_ref[...]                                                  # (TH, Hl) bf16
    for k in range(tmp_ref.shape[0]):
        out_ref[k, ...] = jnp.dot(bh, tmp_ref[k, ...],
                                  preferred_element_type=jnp.float32
                                  ).astype(out_ref.dtype)             # (TH, W)


# ---------------------------------------------------------------------------
# Backbone stub (the backbone is an injected module in the PyTorch code)
# ---------------------------------------------------------------------------
def _avg_pool_nchw(x, k):
    n, c, h, w = x.shape
    return x.reshape(n, c, h // k, k, w // k, k).mean(axis=(3, 5))


def _backbone(x_nchw, p):
    # Deterministic stub: avg-pool + 1x1 conv + ReLU, plain JAX, NCHW.
    low = jnp.maximum(jnp.einsum('nchw,cd->ndhw',
                                 _avg_pool_nchw(x_nchw, p['low_stride']),
                                 p['w_bb_low']), 0.0)
    high = jnp.maximum(jnp.einsum('nchw,cd->ndhw',
                                  _avg_pool_nchw(x_nchw, p['high_stride']),
                                  p['w_bb_high']), 0.0)
    return low, high


# ---------------------------------------------------------------------------
# Forward wrapper
# ---------------------------------------------------------------------------
def lraspp_forward(x_nchw, p):
    x = x_nchw.astype(jnp.float32)
    N, _, H, W = x.shape
    low, high = _backbone(x, p)                 # (N,Cl,Hl,Wl), (N,Ch,Hh,Wh)
    _, Cl, Hl, Wl = low.shape
    _, Ch, Hh, Wh = high.shape
    Ci = p['w_cbr'].shape[1]
    K = p['w_lc'].shape[1]
    Ph, Pl = Hh * Wh, Hl * Wl
    bf = jnp.bfloat16

    high_cf = high.reshape(N, Ch, Ph).astype(bf)
    low_cf = low.reshape(N, Cl, Pl).astype(bf)

    # Pre-transposed weights; eval-mode BN folded into the cbr weight.
    w_cbrT = (p['w_cbr'] * p['bn_scale']).T.astype(bf)       # (Ci, Ch)
    bn_b = p['bn_bias'].T.astype(jnp.float32)                # (Ci, 1)
    w_scaleT = p['w_scale'].T.astype(bf)                     # (Ci, Ch)
    w_hcT = p['w_hc'].T.astype(bf)                           # (K, Ci)
    w_lcT = p['w_lc'].T.astype(bf)                           # (K, Cl)
    b_sum = (p['b_lc'] + p['b_hc']).T.astype(jnp.float32)    # (K, 1)

    # Separable bilinear operators.
    ah_hl = _bilinear_axis_matrix(Hl, Hh).astype(bf)         # (Hl, Hh)
    aw_hlT = _bilinear_axis_matrix(Wl, Wh).T.astype(bf)      # (Wh, Wl)
    bh = _bilinear_axis_matrix(H, Hl).astype(bf)             # (H, Hl)
    bwT = _bilinear_axis_matrix(W, Wl).T.astype(bf)          # (Wl, W)

    # ---- Kernel 1: channel math -------------------------------------------
    yh, yl = pl.pallas_call(
        _head_channels_kernel,
        out_shape=(jax.ShapeDtypeStruct((N, K, Ph), bf),
                   jax.ShapeDtypeStruct((N, K, Pl), jnp.float32)),
        grid=(N,),
        in_specs=[
            pl.BlockSpec((None, Ch, Ph), lambda n: (n, 0, 0)),
            pl.BlockSpec((None, Cl, Pl), lambda n: (n, 0, 0)),
            pl.BlockSpec((Ci, Ch), lambda n: (0, 0)),
            pl.BlockSpec((Ci, 1), lambda n: (0, 0)),
            pl.BlockSpec((Ci, Ch), lambda n: (0, 0)),
            pl.BlockSpec((K, Ci), lambda n: (0, 0)),
            pl.BlockSpec((K, Cl), lambda n: (0, 0)),
            pl.BlockSpec((K, 1), lambda n: (0, 0)),
        ],
        out_specs=(pl.BlockSpec((None, K, Ph), lambda n: (n, 0, 0)),
                   pl.BlockSpec((None, K, Pl), lambda n: (n, 0, 0))),
        compiler_params=pltpu.CompilerParams(
            dimension_semantics=("parallel",), vmem_limit_bytes=_VMEM_LIMIT),
    )(high_cf, low_cf, w_cbrT, bn_b, w_scaleT, w_hcT, w_lcT, b_sum)

    # Free (metadata) reshapes in the wrapper keep in-kernel reshapes lane-safe.
    yh_r = yh.reshape(N, K * Hh, Wh)
    yl_r = yl.reshape(N, K * Hl, Wl)

    # ---- Kernel 2: low-resolution spatial work + W-axis final upsample ----
    tmp = pl.pallas_call(
        _head_spatial_kernel,
        out_shape=jax.ShapeDtypeStruct((N, K, Hl, W), bf),
        grid=(N,),
        in_specs=[
            pl.BlockSpec((None, K * Hh, Wh), lambda n: (n, 0, 0)),
            pl.BlockSpec((None, K * Hl, Wl), lambda n: (n, 0, 0)),
            pl.BlockSpec((Wh, Wl), lambda n: (0, 0)),
            pl.BlockSpec((Hl, Hh), lambda n: (0, 0)),
            pl.BlockSpec((Wl, W), lambda n: (0, 0)),
        ],
        out_specs=pl.BlockSpec((None, K, Hl, W), lambda n: (n, 0, 0, 0)),
        compiler_params=pltpu.CompilerParams(
            dimension_semantics=("parallel",), vmem_limit_bytes=_VMEM_LIMIT),
    )(yh_r, yl_r, aw_hlT, ah_hl, bwT)

    # ---- Kernel 3: H-axis final upsample, tiled over output rows ----------
    TH = _choose_row_tile(H)
    out = pl.pallas_call(
        _upsample_rows_kernel,
        out_shape=jax.ShapeDtypeStruct((N, K, H, W), jnp.float32),
        grid=(N, H // TH),
        in_specs=[
            pl.BlockSpec((TH, Hl), lambda n, j: (j, 0)),
            pl.BlockSpec((None, K, Hl, W), lambda n, j: (n, 0, 0, 0)),
        ],
        out_specs=pl.BlockSpec((None, K, TH, W), lambda n, j: (n, 0, j, 0)),
        compiler_params=pltpu.CompilerParams(
            dimension_semantics=("parallel", "parallel"),
            vmem_limit_bytes=_VMEM_LIMIT),
    )(bh, tmp)

    return {'out': out}   # already NCHW: (N, num_classes, H, W)


# ---------------------------------------------------------------------------
# Pure-JAX reference (original op order + dense Kronecker interp) for checking
# ---------------------------------------------------------------------------
def lraspp_reference(x_nchw, p):
    x = x_nchw.astype(jnp.float32)
    N, _, H, W = x.shape
    low, high = _backbone(x, p)
    _, Cl, Hl, Wl = low.shape
    _, Ch, Hh, Wh = high.shape
    high_p = high.transpose(0, 2, 3, 1).reshape(N, Hh * Wh, Ch)
    low_p = low.transpose(0, 2, 3, 1).reshape(N, Hl * Wl, Cl)
    t = jnp.maximum(high_p @ p['w_cbr'] * p['bn_scale'] + p['bn_bias'], 0.0)
    pooled = jnp.mean(high_p, axis=1, keepdims=True)
    s = 1.0 / (1.0 + jnp.exp(-(pooled @ p['w_scale'])))
    xh = t * s                                                      # (N, Ph, Ci)
    m1 = jnp.kron(_bilinear_axis_matrix(Hl, Hh), _bilinear_axis_matrix(Wl, Wh))
    m2 = jnp.kron(_bilinear_axis_matrix(H, Hl), _bilinear_axis_matrix(W, Wl))
    x_up = jnp.einsum('pq,nqc->npc', m1, xh)
    logits = low_p @ p['w_lc'] + p['b_lc'] + x_up @ p['w_hc'] + p['b_hc']
    out = jnp.einsum('pq,nqc->npc', m2, logits)                     # (N, Po, K)
    return out.reshape(N, H, W, -1).transpose(0, 3, 1, 2)


# ---------------------------------------------------------------------------
# Deterministic parameter init (shapes follow LRASPPHead.__init__)
# ---------------------------------------------------------------------------
def init_params(key, cin, low_channels, high_channels, num_classes,
                inter_channels, low_stride=4, high_stride=8):
    ks = jax.random.split(key, 12)
    rnd = lambda k, shape, s=0.1: jax.random.normal(k, shape, jnp.float32) * s

    # BatchNorm2d(inter_channels) applied in eval/inference mode; running stats
    # folded into a per-channel affine (scale, bias).
    # TODO(synk): training-mode BatchNorm (batch statistics) is not implemented.
    gamma = 1.0 + 0.1 * jax.random.normal(ks[4], (inter_channels,), jnp.float32)
    beta = 0.1 * jax.random.normal(ks[5], (inter_channels,), jnp.float32)
    r_mean = 0.1 * jax.random.normal(ks[6], (inter_channels,), jnp.float32)
    r_var = 1.0 + 0.1 * jnp.abs(jax.random.normal(ks[7], (inter_channels,), jnp.float32))
    eps = 1e-5
    bn_scale = gamma / jnp.sqrt(r_var + eps)
    bn_bias = beta - r_mean * bn_scale

    return dict(
        low_stride=low_stride, high_stride=high_stride,
        w_bb_low=rnd(ks[0], (cin, low_channels)),
        w_bb_high=rnd(ks[1], (cin, high_channels)),
        w_cbr=rnd(ks[2], (high_channels, inter_channels)),
        w_scale=rnd(ks[3], (high_channels, inter_channels)),
        bn_scale=bn_scale.reshape(1, inter_channels),
        bn_bias=bn_bias.reshape(1, inter_channels),
        w_lc=rnd(ks[8], (low_channels, num_classes)),
        b_lc=rnd(ks[9], (1, num_classes)),
        w_hc=rnd(ks[10], (inter_channels, num_classes)),
        b_hc=rnd(ks[11], (1, num_classes)),
    )


if __name__ == "__main__":
    key = jax.random.PRNGKey(0)
    N, Cin, H, W = 2, 3, 32, 32
    low_channels, high_channels, num_classes, inter_channels = 8, 16, 4, 16

    kx, kp = jax.random.split(key)
    x_nchw = jax.random.normal(kx, (N, Cin, H, W), jnp.float32)
    params = init_params(kp, Cin, low_channels, high_channels, num_classes,
                         inter_channels)

    result = lraspp_forward(x_nchw, params)
    out = result['out']
    jax.block_until_ready(out)

    ref = lraspp_reference(x_nchw, params)
    assert out.shape == (N, num_classes, H, W), out.shape
    err = float(jnp.max(jnp.abs(out - ref)))
    # bf16 matmul operands with f32 accumulation -> relaxed tolerance.
    assert jnp.allclose(out, ref, rtol=3e-2, atol=3e-2), err
    print("KERNEL_OK")
</pallas_src>

<mosaic_0001>
module attributes {stable_mosaic.version = 11 : i64} {
  func.func @_head_channels_kernel(%arg0: i32, %arg1: memref<1x16x16xbf16, #tpu.memory_space<vmem>>, %arg2: memref<1x8x64xbf16, #tpu.memory_space<vmem>>, %arg3: memref<16x16xbf16, #tpu.memory_space<vmem>>, %arg4: memref<16x1xf32, #tpu.memory_space<vmem>>, %arg5: memref<16x16xbf16, #tpu.memory_space<vmem>>, %arg6: memref<4x16xbf16, #tpu.memory_space<vmem>>, %arg7: memref<4x8xbf16, #tpu.memory_space<vmem>>, %arg8: memref<4x1xf32, #tpu.memory_space<vmem>>, %arg9: memref<1x4x16xbf16, #tpu.memory_space<vmem>>, %arg10: memref<1x4x64xf32, #tpu.memory_space<vmem>>) attributes {dimension_semantics = [#tpu.dimension_semantics<parallel>], iteration_bounds = array<i64: 2>, scalar_prefetch = 0 : i64, scratch_operands = 0 : i64, tpu.core_type = #tpu.core_type<tc>, window_params = [{transform_indices = @transform_0, window_bounds = array<i64: 1, 16, 16>}, {transform_indices = @transform_1, window_bounds = array<i64: 1, 8, 64>}, {pipeline_mode = #tpu.pipeline_mode<synchronous>, transform_indices = @transform_2, window_bounds = array<i64: 16, 16>}, {pipeline_mode = #tpu.pipeline_mode<synchronous>, transform_indices = @transform_3, window_bounds = array<i64: 16, 1>}, {pipeline_mode = #tpu.pipeline_mode<synchronous>, transform_indices = @transform_4, window_bounds = array<i64: 16, 16>}, {pipeline_mode = #tpu.pipeline_mode<synchronous>, transform_indices = @transform_5, window_bounds = array<i64: 4, 16>}, {pipeline_mode = #tpu.pipeline_mode<synchronous>, transform_indices = @transform_6, window_bounds = array<i64: 4, 8>}, {pipeline_mode = #tpu.pipeline_mode<synchronous>, transform_indices = @transform_7, window_bounds = array<i64: 4, 1>}, {transform_indices = @transform_8, window_bounds = array<i64: 1, 4, 16>}, {transform_indices = @transform_9, window_bounds = array<i64: 1, 4, 64>}]} {
    %c0 = arith.constant 0 : index
    %c0_0 = arith.constant 0 : index
    %c0_1 = arith.constant 0 : index
    %0 = vector.load %arg1[%c0, %c0_0, %c0_1] : memref<1x16x16xbf16, #tpu.memory_space<vmem>>, vector<1x16x16xbf16>
    %1 = vector.shape_cast %0 : vector<1x16x16xbf16> to vector<16x16xbf16>
    %c0_2 = arith.constant 0 : index
    %c0_3 = arith.constant 0 : index
    %2 = vector.load %arg3[%c0_2, %c0_3] : memref<16x16xbf16, #tpu.memory_space<vmem>>, vector<16x16xbf16>
    %cst = arith.constant dense<0.000000e+00> : vector<16x16xf32>
    %3 = tpu.matmul %2, %1, %cst {dimension_numbers = #tpu.dot_dimension_numbers<[1], [0], [0], [1], [0, 0, 1, 1], [], []>} : vector<16x16xbf16>, vector<16x16xbf16>, vector<16x16xf32> -> vector<16x16xf32>
    %c0_4 = arith.constant 0 : index
    %c0_5 = arith.constant 0 : index
    %4 = vector.load %arg4[%c0_4, %c0_5] : memref<16x1xf32, #tpu.memory_space<vmem>>, vector<16x1xf32>
    %5 = vector.broadcast %4 : vector<16x1xf32> to vector<16x16xf32>
    %6 = arith.addf %3, %5 : vector<16x16xf32>
    %cst_6 = arith.constant 0.000000e+00 : f32
    %7 = vector.broadcast %cst_6 : f32 to vector<16x16xf32>
    %8 = arith.maximumf %6, %7 : vector<16x16xf32>
    %9 = arith.extf %1 : vector<16x16xbf16> to vector<16x16xf32>
    %cst_7 = arith.constant dense<0.000000e+00> : vector<16xf32>
    %10 = vector.multi_reduction <add>, %9, %cst_7 [1] : vector<16x16xf32> to vector<16xf32>
    %11 = vector.shape_cast %10 : vector<16xf32> to vector<16x1xf32>
    %cst_8 = arith.constant 1.600000e+01 : f32
    %12 = vector.broadcast %cst_8 : f32 to vector<16x1xf32>
    %13 = arith.divf %11, %12 : vector<16x1xf32>
    %c0_9 = arith.constant 0 : index
    %c0_10 = arith.constant 0 : index
    %14 = vector.load %arg5[%c0_9, %c0_10] : memref<16x16xbf16, #tpu.memory_space<vmem>>, vector<16x16xbf16>
    %15 = arith.truncf %13 : vector<16x1xf32> to vector<16x1xbf16>
    %cst_11 = arith.constant dense<0.000000e+00> : vector<16x1xf32>
    %16 = tpu.matmul %14, %15, %cst_11 {dimension_numbers = #tpu.dot_dimension_numbers<[1], [0], [0], [1], [0, 0, 1, 1], [], []>} : vector<16x16xbf16>, vector<16x1xbf16>, vector<16x1xf32> -> vector<16x1xf32>
    %cst_12 = arith.constant 0.000000e+00 : f32
    %17 = vector.broadcast %cst_12 : f32 to vector<16x1xf32>
    %18 = arith.subf %17, %16 : vector<16x1xf32>
    %19 = math.exp %18 : vector<16x1xf32>
    %cst_13 = arith.constant 1.000000e+00 : f32
    %20 = vector.broadcast %cst_13 : f32 to vector<16x1xf32>
    %21 = arith.addf %20, %19 : vector<16x1xf32>
    %cst_14 = arith.constant 1.000000e+00 : f32
    %22 = vector.broadcast %cst_14 : f32 to vector<16x1xf32>
    %23 = arith.divf %22, %21 : vector<16x1xf32>
    %24 = vector.broadcast %23 : vector<16x1xf32> to vector<16x16xf32>
    %25 = arith.mulf %8, %24 : vector<16x16xf32>
    %26 = arith.truncf %25 : vector<16x16xf32> to vector<16x16xbf16>
    %c0_15 = arith.constant 0 : index
    %c0_16 = arith.constant 0 : index
    %27 = vector.load %arg6[%c0_15, %c0_16] : memref<4x16xbf16, #tpu.memory_space<vmem>>, vector<4x16xbf16>
    %cst_17 = arith.constant dense<0.000000e+00> : vector<4x16xf32>
    %28 = tpu.matmul %27, %26, %cst_17 {dimension_numbers = #tpu.dot_dimension_numbers<[1], [0], [0], [1], [0, 0, 1, 1], [], []>} : vector<4x16xbf16>, vector<16x16xbf16>, vector<4x16xf32> -> vector<4x16xf32>
    %29 = arith.truncf %28 : vector<4x16xf32> to vector<4x16xbf16>
    %c0_18 = arith.constant 0 : index
    %c0_19 = arith.constant 0 : index
    %c0_20 = arith.constant 0 : index
    %30 = vector.load %arg9[%c0_18, %c0_19, %c0_20] : memref<1x4x16xbf16, #tpu.memory_space<vmem>>, vector<1x4x16xbf16>
    %31 = vector.shape_cast %30 : vector<1x4x16xbf16> to vector<4x16xbf16>
    %32 = vector.shape_cast %29 : vector<4x16xbf16> to vector<1x4x16xbf16>
    tpu.vector_store %arg9[%c0_18, %c0_19, %c0_20], %32 {strides = array<i32>} : memref<1x4x16xbf16, #tpu.memory_space<vmem>>, vector<1x4x16xbf16>,
    %c0_21 = arith.constant 0 : index
    %c0_22 = arith.constant 0 : index
    %33 = vector.load %arg7[%c0_21, %c0_22] : memref<4x8xbf16, #tpu.memory_space<vmem>>, vector<4x8xbf16>
    %c0_23 = arith.constant 0 : index
    %c0_24 = arith.constant 0 : index
    %c0_25 = arith.constant 0 : index
    %34 = vector.load %arg2[%c0_23, %c0_24, %c0_25] : memref<1x8x64xbf16, #tpu.memory_space<vmem>>, vector<1x8x64xbf16>
    %35 = vector.shape_cast %34 : vector<1x8x64xbf16> to vector<8x64xbf16>
    %cst_26 = arith.constant dense<0.000000e+00> : vector<4x64xf32>
    %36 = tpu.matmul %33, %35, %cst_26 {dimension_numbers = #tpu.dot_dimension_numbers<[1], [0], [0], [1], [0, 0, 1, 1], [], []>} : vector<4x8xbf16>, vector<8x64xbf16>, vector<4x64xf32> -> vector<4x64xf32>
    %c0_27 = arith.constant 0 : index
    %c0_28 = arith.constant 0 : index
    %37 = vector.load %arg8[%c0_27, %c0_28] : memref<4x1xf32, #tpu.memory_space<vmem>>, vector<4x1xf32>
    %38 = vector.broadcast %37 : vector<4x1xf32> to vector<4x64xf32>
    %39 = arith.addf %36, %38 : vector<4x64xf32>
    %c0_29 = arith.constant 0 : index
    %c0_30 = arith.constant 0 : index
    %c0_31 = arith.constant 0 : index
    %40 = vector.load %arg10[%c0_29, %c0_30, %c0_31] : memref<1x4x64xf32, #tpu.memory_space<vmem>>, vector<1x4x64xf32>
    %41 = vector.shape_cast %40 : vector<1x4x64xf32> to vector<4x64xf32>
    %42 = vector.shape_cast %39 : vector<4x64xf32> to vector<1x4x64xf32>
    tpu.vector_store %arg10[%c0_29, %c0_30, %c0_31], %42 {strides = array<i32>} : memref<1x4x64xf32, #tpu.memory_space<vmem>>, vector<1x4x64xf32>,
    return
  }
  func.func @transform_0(%arg0: i32) -> (i32, i32, i32) {
    %c0_i32 = arith.constant 0 : i32
    %c0_i32_0 = arith.constant 0 : i32
    %c0_i32_1 = arith.constant 0 : i32
    return %arg0, %c0_i32, %c0_i32_0 : i32, i32, i32
  }
  func.func @transform_1(%arg0: i32) -> (i32, i32, i32) {
    %c0_i32 = arith.constant 0 : i32
    %c0_i32_0 = arith.constant 0 : i32
    %c0_i32_1 = arith.constant 0 : i32
    return %arg0, %c0_i32, %c0_i32_0 : i32, i32, i32
  }
  func.func @transform_2(%arg0: i32) -> (i32, i32) {
    %c0_i32 = arith.constant 0 : i32
    %c0_i32_0 = arith.constant 0 : i32
    %c0_i32_1 = arith.constant 0 : i32
    return %c0_i32, %c0_i32_0 : i32, i32
  }
  func.func @transform_3(%arg0: i32) -> (i32, i32) {
    %c0_i32 = arith.constant 0 : i32
    %c0_i32_0 = arith.constant 0 : i32
    %c0_i32_1 = arith.constant 0 : i32
    return %c0_i32, %c0_i32_0 : i32, i32
  }
  func.func @transform_4(%arg0: i32) -> (i32, i32) {
    %c0_i32 = arith.constant 0 : i32
    %c0_i32_0 = arith.constant 0 : i32
    %c0_i32_1 = arith.constant 0 : i32
    return %c0_i32, %c0_i32_0 : i32, i32
  }
  func.func @transform_5(%arg0: i32) -> (i32, i32) {
    %c0_i32 = arith.constant 0 : i32
    %c0_i32_0 = arith.constant 0 : i32
    %c0_i32_1 = arith.constant 0 : i32
    return %c0_i32, %c0_i32_0 : i32, i32
  }
  func.func @transform_6(%arg0: i32) -> (i32, i32) {
    %c0_i32 = arith.constant 0 : i32
    %c0_i32_0 = arith.constant 0 : i32
    %c0_i32_1 = arith.constant 0 : i32
    return %c0_i32, %c0_i32_0 : i32, i32
  }
  func.func @transform_7(%arg0: i32) -> (i32, i32) {
    %c0_i32 = arith.constant 0 : i32
    %c0_i32_0 = arith.constant 0 : i32
    %c0_i32_1 = arith.constant 0 : i32
    return %c0_i32, %c0_i32_0 : i32, i32
  }
  func.func @transform_8(%arg0: i32) -> (i32, i32, i32) {
    %c0_i32 = arith.constant 0 : i32
    %c0_i32_0 = arith.constant 0 : i32
    %c0_i32_1 = arith.constant 0 : i32
    return %arg0, %c0_i32, %c0_i32_0 : i32, i32, i32
  }
  func.func @transform_9(%arg0: i32) -> (i32, i32, i32) {
    %c0_i32 = arith.constant 0 : i32
    %c0_i32_0 = arith.constant 0 : i32
    %c0_i32_1 = arith.constant 0 : i32
    return %arg0, %c0_i32, %c0_i32_0 : i32, i32, i32
  }
}

</mosaic_0001>

<bundles_post_ra>
// kernel: tpu_custom_call.1
= control target key start
LH: loop header
LB: loop body
LE: loop exit
PB: predicated region body
PF: predicated region fallthrough
CT: control target
= control target key end

     0   :  { %15 = vsyncpa [#allocation3], 0  ;;  %s1300_s0 = inlined_call_operand.vmem [shape: bf16[2,16,16], index: 0, kind: input, shape index: {}]   ;;  %s1301_s1 = inlined_call_operand.vmem [shape: bf16[2,8,64], index: 1, kind: input, shape index: {}]   ;;  %s1302_s2 = inlined_call_operand.hbm [shape: bf16[16,16], index: 2, kind: input, shape index: {}]   ;;  %s1303_s3 = inlined_call_operand.vmem [shape: f32[16,1], index: 3, kind: input, shape index: {}]   ;;  %s1304_s4 = inlined_call_operand.vmem [shape: bf16[16,16], index: 4, kind: input, shape index: {}]   ;;  %s1305_s5 = inlined_call_operand.vmem [shape: bf16[4,16], index: 5, kind: input, shape index: {}]   ;;  %s1306_s6 = inlined_call_operand.vmem [shape: bf16[4,8], index: 6, kind: input, shape index: {}]   ;;  %s1307_s7 = inlined_call_operand.vmem [shape: f32[4,1], index: 7, kind: input, shape index: {}]   ;;  %s1308_s8 = inlined_call_operand.hbm [shape: bf16[2,4,16], index: 8, kind: output, shape index: {0}]   ;;  %s1309_s9 = inlined_call_operand.hbm [shape: f32[2,4,64], index: 9, kind: output, shape index: {1}]  }
   0x1   :  { %16 = vsyncpa [#allocation4], 0 }
   0x2   :  { %18 = vsyncpa [#allocation4 + $0x1], 0 }
   0x3   :  { %19 = vsyncpa [#allocation7], 0 }
   0x4   :  { %21 = vsyncpa [#allocation7 + $0x1], 0  ;;  %s1106_s30 = smov 0   ;;  %s1108_s10 = smov 0  }
   0x5   :  { %s1110_s11 = smov 0   ;;  %s1112_s12 = smov 0  }
   0x6 LB: > { %s1127_s13 = sadd.s32 4294967295, %s1046_s12   ;;  %s789_s14 = sadd.s32 4294967294, %s1046_s12   ;;  %s1046_s12 = sphi %s1112_s12, %s1325_s12   ;;  %s1042_s11 = sphi %s1110_s11, %s1324_s11   ;;  %s1038_s10 = sphi %s1108_s10, %s1323_s10   ;;  %s1034_s30 = sphi %s1106_s30, %s1322_s30  }
   0x7   : > { %s1131_s15 = sadd.s32 1, %s1046_s12   ;;  %s212_s16 = sadd.s32 1, %s1042_s11 }
   0x8   : > { %s209_s17 = ssub.s32 %s1046_s12, %s1131_s15  ;;  %p222_p0 = scmp.ne.s32.totalorder %s1042_s11, %s1038_s10 }
   0x9   : > { %p210_p1 = scmp.eq.s32.totalorder %s209_s17, 0  ;;  %p223_p2 = scmp.eq.s32.totalorder %s1127_s13, 1 }
   0xa   : > { %p228_p3 = scmp.ne.s32.totalorder %s1038_s10, %s1034_s30  ;;  %p229_p4 = scmp.eq.s32.totalorder %s789_s14, 1 }
   0xb   : > { %s1142_s18 = scalar_select %p210_p1, %s1042_s11, %s212_s16  }
   0xc   : > { %p1144_p5 = por %p223_p2, %p222_p0  ;;  %p1148_p6 = por %p229_p4, %p228_p3 }
   0xd   : > { %p790_p7 = scmp.ge.s32.totalorder %s1046_s12, 1  ;;  %p262_p8 = scmp.lt.s32.totalorder %s1046_s12, 3 }
   0xe   : > { %s1313_s19 = scalar_select %p1144_p5, 1, 0 }
   0xf   : > { %s1314_s20 = scalar_select %p1148_p6, 1, 0 }
  0x10   : > { %p1310_p9 = scmp.eq.s32.totalorder %s1127_s13, 0  ;;  %p1155_p10 = pnand %p790_p7, %p262_p8 }
  0x11   : > { %s1048_s22 = smov [#allocation2]   ;;  %s920_s27 = scalar_lea.hbm %s1302_s2, 128 }
  0x12   : > { %s1315_s21 = scalar_select %p1155_p10, 1, 0 }
  0x13   : > { %s274_s23 = sshll.u32 %s1048_s22, 4  ;;  %p854_p11 = pneg %p1155_p10  ;;  %s275_s23 = int_to_ptr.vmem [resolvable:$true] %s274_s23 }
  0x14   : > { %p921_p13 = scmp.ne.s32.totalorder %s1302_s2, %s920_s27  ;;  %p927_p3 = scmp.lt.u32.totalorder %s920_s27, %s1302_s2 }
  0x15   : > { %p1163_p12 = pnand %p1310_p9, %p854_p11 }
  0x17   : > { %p922_p0 = pneg %p1163_p12 }
  0x19   : > { %p923_p1 = pnand %p922_p0, %p921_p13 }
  0x1b   : > { %p924_p2 = pneg %p923_p1 }
  0x1d   : > { %p929_p4 = pnand %p927_p3, %p924_p2 }
  0x1f   : > { %932 = shalt.err (!%p929_p4)
}
  0x20   : > { %s933_s17 = scalar_lea.vmem %s275_s23, 128  ;;  %p941_p9 = scmp.lt.s32.totalorder %s275_s23, %s275_s23 }
  0x21   : > { %p934_p7 = scmp.ne.s32.totalorder %s275_s23, %s933_s17  ;;  %p942_p6 = scmp.lt.s32.totalorder %s933_s17, %s933_s17 }
  0x23   : > { %p936_p8 = pnand %p934_p7, %p922_p0  ;;  %p943_p5 = por %p942_p6, %p941_p9 }
  0x25   : > { %p937_p11 = pneg %p936_p8 }
  0x27   : > { %p944_p10 = pnand %p943_p5, %p937_p11 }
  0x29   : > { %947 = shalt.err (!%p944_p10)
}
  0x2a   : > { %s1049_s22 = smov 64   ;;  %s1050_s25 = smov 4  }
  0x2b   : > { %857 = dma.hbm_to_vmem [thread:$0]  (!%p1163_p12), %s1302_s2, 128, %s275_s23, [#allocation3], %s1049_s22, %s1049_s22, %s1050_s25  }
  0x2c   : > { %p1317_p13 = scmp.ne.s32.totalorder %s1315_s21, 0 }
  0x2d   : > { %p1318_p1 = scmp.eq.s32.totalorder (!%p1317_p13), %s1127_s13, 0 }
  0x2e   : > { %320 = sbr.rel (%p1317_p13) target bundleno = 822 (0x336), region = 52 }
  0x35   : > { %1021 = dma.done.wait (%p1318_p1), [#allocation3], 128   ;;  %p1319_p0 = pmov %p1318_p1 }
  0x36   : > { %p365_p5 = scmp.lt.s32.totalorder %s1127_s13, 1  ;;  %vm402_vm0 = vcmask 130048   ;;  %v1051_v5 = vmov 0.0   ;;  %vm1052_vm1 = vmmov 0   ;;  %v910_v6 = vld [vmem:[#allocation2] sm:$0xff]   ;;  %vm596_vm2 = vcmask 1043456  }
  0x37   : > { %1023 = vsyncadd (%p1319_p0), [#allocation3], 4294967168  ;;  %828 = vmatprep.subr.bf16.mxu1 %v1051_v5  ;;  %822 = vmatprep.subr.bf16.mxu0 %v1051_v5  ;;  %v908_v13 = vld [vmem:[%s1304_s4] sm:$0xff]   ;;  %vm592_vm3 = vcmask 64512   ;;  %v1053_v16 = vmov 0   ;;  %v380_v18 = vld [vmem:[%s1303_s3 + $0x8] sm:$0xff] }
  0x38   : > { %s366_s27 = scalar_select %p365_p5, %s1127_s13, 1  ;;  %830 = vmatprep.mubr.msk.bf16.mxu1 %vm1052_vm1, %v1051_v5  ;;  %824 = vmatprep.mubr.msk.bf16.mxu0 %vm1052_vm1, %v1051_v5  ;;  %v584_v15 = vld [vmem:[%s1306_s6] sm:$0x3]  ;;  %vm640_vm4 = vcmask 519168  }
  0x39   : > { %906 = vset.pattern.permute.xlu1 %v1053_v16  ;;  %v379_v17 = vld [vmem:[%s1303_s3] sm:$0xff]  ;;  %907 = vset.pattern.permute.xlu0 %v1053_v16  ;;  %s1221_s17 = sand.u32 1, %s1038_s10   ;;  %p1320_p9 = scmp.ne.s32.totalorder %s1313_s19, 0 }
  0x3a   : > { %s813_s29 = sshll.u32 %s366_s27, 3  ;;  %s799_s21 = sshll.u32 %s366_s27, 2  ;;  %383 = vperm.xlu1 %906, %v379_v17   ;;  %v586_v37 = vld [vmem:[%s1307_s7] sm:$0xf] }
  0x3b   : > { %s369_s16 = scalar_lea.vmem %s1300_s0, %s813_s29  ;;  %s373_s22 = scalar_lea.vmem %s1301_s1, %s799_s21  ;;  %v537_v55 = vld [vmem:[%s1305_s5] sm:$0x3] }
  0x3c   : > { %v375_v0 = vld [vmem:[%s369_s16] sm:$0xff]   ;;  %s810_s27 = sshll.u32 %s1127_s13, 6  ;;  %s648_s21 = scalar_lea.sflag [#allocation7], %s1221_s17 }
  0x3d   : > { %v449_v1 = vunpack.c.l.bf16 %v375_v0  ;;  %v450_v2 = vunpack.c.h.bf16 %v375_v0  ;;  %823 = vmatpush3.bf16.msra.mxu0 %v375_v0  ;;  %v585_v12 = vld [vmem:[%s373_s22] sm:$0xf]  ;;  %s796_s22 = sshll.u32 %s1221_s17, 2  ;;  %s1232_s16 = scalar_lea.hbm %s1309_s9, %s810_s27 }
  0x3e   : > { %834 = vmatprep.subr.bf16.mxu0 %v1051_v5  ;;  %v598_v14 = vsel %vm596_vm2, %v585_v12, 0  ;;  %388 = vperm.xlu1 %906, %v380_v18   ;;  %s364_s28 = scalar_lea.vmem [#allocation6], %s796_s22  ;;  %s1054_s25 = smov [#allocation6]  }
  0x3f   : > { %v451_v3 = vsel %vm402_vm0, %v449_v1, 0.0  ;;  %v454_v4 = vsel %vm402_vm0, %v450_v2, 0.0  ;;  %s674_s29 = sshll.u32 %s364_s28, 4  ;;  %s952_s26 = sshll.u32 %s1054_s25, 4  ;;  %s675_s29 = int_to_ptr.vmem [resolvable:$true] %s674_s29  ;;  %s953_s26 = int_to_ptr.vmem [resolvable:$false] %s952_s26 }
  0x40   : > { %452 = vadd.xlane.f32.xlu0 %v451_v3  ;;  %825 = vmatmul.mubr.msk.bf16.vlgmr.msra.gmra.mrb[0].mxu0 %vm402_vm0, %v910_v6  ;;  %s948_s23 = scalar_lea.vmem %s675_s29, 64  ;;  %s954_s22 = scalar_lea.vmem %s953_s26, 128 }
  0x41   : > { %836 = vmatprep.mubr.msk.bf16.mxu0 %vm1052_vm1, %v1051_v5  ;;  %p949_p6 = scmp.ne.s32.totalorder %s675_s29, %s948_s23  ;;  %p955_p2 = scmp.lt.s32.totalorder %s675_s29, %s953_s26 }
  0x42   : > { %p956_p3 = scmp.lt.s32.totalorder %s954_s22, %s948_s23 }
  0x43   : > { %p950_p10 = pnand %p949_p6, %p1320_p9 }
  0x44   : > { %455 = vadd.xlane.f32.xlu0 %v454_v4  ;;  %p957_p4 = por %p956_p3, %p955_p2 }
  0x45   : > { %p951_p12 = pneg %p950_p10 }
  0x47   : > { %p958_p7 = pnand %p957_p4, %p951_p12 }
  0xb9   : > { %v384_v42 = vpop.permute.xlu1 %383 }
  0xbd   : > { %v389_v43 = vpop.permute.xlu1 %388 }
  0xcd   : > { %v453_v7 = vpop.xlane.xlu0 %452 }
  0xce   : > { %v458_v9 = vmul.f32 0.0625, %v453_v7 }
  0xd1   : > { %v456_v8 = vpop.xlane.xlu0 %455 }
  0xd2   : > { %v459_v10 = vmul.f32 0.0625, %v456_v8 }
  0xd4   : > { %v462_v11 = vpack.c.bf16 %v459_v10, %v458_v9 }
  0xd6   : > { %829 = vmatpush3.bf16.msra.mxu1 %v462_v11 }
  0xd7   : > { %840 = vmatprep.subr.bf16.mxu1 %v1051_v5 }
  0xd9   : > { %831 = vmatmul.mubr.msk.bf16.vlgmr.msra.gmra.mrb[0].mxu1 %vm402_vm0, %v908_v13 }
  0xda   : > { %841 = vmatpush3.bf16.msra.mxu1 %v598_v14  ;;  %842 = vmatprep.mubr.msk.bf16.mxu1 %vm1052_vm1, %v1051_v5 }
  0xe1   : > { %843 = vmatmul.mubr.msk.bf16.vlgmr.msra.gmra.mrb[4].mxu1 %vm592_vm3, %v584_v15 }
 0x113   : > { %v440_v19 = vpop.f32.mrb[0].mxu0 }
 0x114   : > { %v826_v20 = vpop.f32.mrb[1].mxu0  ;;  %v441_v44 = vadd.f32 %v440_v19, %v384_v42 }
 0x115   : > { %v443_v21 = vpop.f32.mrb[2].mxu0 }
 0x116   : > { %v827_v22 = vpop.f32.mrb[3].mxu0  ;;  %v444_v45 = vadd.f32 %v443_v21, %v389_v43  ;;  %v447_v47 = vmax.f32 %v441_v44, 0.0 }
 0x118   : > { %v448_v48 = vmax.f32 %v444_v45, 0.0 }
 0x1ac   : > { %v505_v23 = vpop.f32.mrb[0].mxu1 }
 0x1ad   : > { %v512_v24 = vsub.f32 0.0, %v505_v23  ;;  %v832_v25 = vpop.f32.mrb[1].mxu1 }
 0x1ae   : > { %v508_v26 = vpop.f32.mrb[2].mxu1 }
 0x1af   : > { %v514_v27 = vmul.f32 1.442695, %v512_v24  ;;  %v513_v28 = vsub.f32 0.0, %v508_v26  ;;  %v833_v29 = vpop.f32.mrb[3].mxu1 }
 0x1b1   : > { %912 = vpow2.f32 %v514_v27  ;;  %v516_v30 = vmul.f32 1.442695, %v513_v28 }
 0x1b3   : > { %914 = vpow2.f32 %v516_v30 }
 0x1b4   : > { %v634_v38 = vpop.f32.mrb[4].mxu1 }
 0x1b5   : > { %v844_v39 = vpop.f32.mrb[5].mxu1 }
 0x1b6   : > { %v637_v40 = vpop.f32.mrb[6].mxu1 }
 0x1b7   : > { %v845_v41 = vpop.f32.mrb[7].mxu1 }
 0x1bb   : > { %v913_v31 = vpop.eup %912 }
 0x1bc   : > { %v518_v32 = vadd.f32 1.0, %v913_v31 }
 0x1bd   : > { %v915_v33 = vpop.eup %914 }
 0x1be   : > { %916 = vrcp.f32 %v518_v32  ;;  %v519_v34 = vadd.f32 1.0, %v915_v33 }
 0x1c0   : > { %918 = vrcp.f32 %v519_v34 }
 0x1c8   : > { %v917_v35 = vpop.eup %916 }
 0x1c9   : > { %526 = vperm.xlu0 %907, %v917_v35  }
 0x1ca   : > { %v919_v36 = vpop.eup %918 }
 0x1cb   : > { %531 = vperm.xlu1 %906, %v919_v36  }
 0x1cf   : > { %589 = vperm.xlu1 %906, %v586_v37  }
 0x248   : > { %v527_v46 = vpop.permute.xlu0 %526 }
 0x249   : > { %v534_v50 = vmul.f32 %v527_v46, %v447_v47 }
 0x24a   : > { %v532_v49 = vpop.permute.xlu1 %531 }
 0x24b   : > { %v535_v51 = vmul.f32 %v532_v49, %v448_v48 }
 0x24d   : > { %v536_v52 = vpack.c.bf16 %v535_v51, %v534_v50 }
 0x24e   : > { %v590_v53 = vpop.permute.xlu1 %589 }
 0x24f   : > { %v635_v54 = vadd.f32 %v634_v38, %v590_v53  ;;  %835 = vmatpush3.bf16.msra.mxu0 %v536_v52 }
 0x251   : > { %641 = vst.msk [vmem:[%s364_s28] sm:$0xf] %vm640_vm4, %v635_v54 }
 0x252   : > { %837 = vmatmul.mubr.msk.bf16.vlgmr.msra.gmra.mrb[4].mxu0 %vm402_vm0, %v537_v55 }
 0x253   : > { %961 = shalt.err (!%p958_p7)
}
 0x254   : > { %s962_s28 = scalar_lea.hbm %s1232_s16, 64  ;;  %s966_s24 = scalar_lea.hbm %s1309_s9, 128 }
 0x255   : > { %p963_p8 = scmp.ne.s32.totalorder %s1232_s16, %s962_s28  ;;  %p967_p1 = scmp.lt.u32.totalorder %s1232_s16, %s1309_s9 }
 0x256   : > { %p968_p0 = scmp.lt.u32.totalorder %s966_s24, %s962_s28  ;;  %p970_p6 = scmp.lt.u32.totalorder %s962_s28, %s1232_s16 }
 0x257   : > { %p964_p11 = pnand %p963_p8, %p1320_p9 }
 0x258   : > { %p969_p5 = por %p968_p0, %p967_p1 }
 0x259   : > { %p965_p13 = pneg %p964_p11 }
 0x25a   : > { %p971_p10 = por %p970_p6, %p969_p5 }
 0x25c   : > { %p972_p12 = pnand %p971_p10, %p965_p13 }
 0x25e   : > { %975 = shalt.err (!%p972_p12)
}
 0x25f   : > { %851 = dma.vmem_to_hbm [thread:$0]  (%p1320_p9), %s675_s29, 64, %s1232_s16, %s648_s21   ;;  %vm582_vm5 = vcmask 123904  }
 0x260   : > { %s795_s23 = sshll.u32 %s1221_s17, 1  ;;  %s809_s22 = sshll.u32 %s1127_s13, 5 }
 0x261   : > { %s357_s27 = scalar_lea.vmem [#allocation5], %s795_s23  ;;  %s1257_s25 = scalar_lea.hbm %s1308_s8, %s809_s22 }
 0x262   : > { %s661_s14 = sshll.u32 %s357_s27, 4  ;;  %s643_s13 = scalar_lea.sflag [#allocation4], %s1221_s17  ;;  %s1259_s14 = int_to_ptr.vmem [resolvable:$true] %s661_s14 }
 0x263   : > { %s976_s29 = scalar_lea.vmem %s1259_s14, 32  ;;  %s1055_s16 = smov [#allocation5]  }
 0x264   : > { %p977_p2 = scmp.ne.s32.totalorder %s1259_s14, %s976_s29  ;;  %s980_s21 = sshll.u32 %s1055_s16, 4  ;;  %s981_s21 = int_to_ptr.vmem [resolvable:$false] %s980_s21 }
 0x265   : > { %s982_s26 = scalar_lea.vmem %s981_s21, 64  ;;  %p983_p7 = scmp.lt.s32.totalorder %s1259_s14, %s981_s21 }
 0x266   : > { %p978_p3 = pnand %p977_p2, %p1320_p9  ;;  %p984_p8 = scmp.lt.s32.totalorder %s982_s26, %s976_s29 }
 0x268   : > { %p979_p4 = pneg %p978_p3  ;;  %p985_p11 = por %p984_p8, %p983_p7 }
 0x26a   : > { %p986_p13 = pnand %p985_p11, %p979_p4 }
 0x325   : > { %v575_v56 = vpop.f32.mrb[4].mxu0 }
 0x326   : > { %v581_v57 = vpack.c.bf16 %v575_v56, %v575_v56  ;;  %v838_v58 = vpop.f32.mrb[5].mxu0 }
 0x327   : > { %v578_v59 = vpop.f32.mrb[6].mxu0 }
 0x328   : > { %v839_v60 = vpop.f32.mrb[7].mxu0  ;;  %583 = vst.msk [vmem:[%s357_s27] sm:$0x3] %vm582_vm5, %v581_v57 }
 0x329   : > { %989 = shalt.err (!%p986_p13)
}
 0x32a   : > { %s990_s17 = scalar_lea.hbm %s1257_s25, 32  ;;  %s994_s27 = scalar_lea.hbm %s1308_s8, 64 }
 0x32b   : > { %p991_p1 = scmp.ne.s32.totalorder %s1257_s25, %s990_s17  ;;  %p995_p6 = scmp.lt.u32.totalorder %s1257_s25, %s1308_s8 }
 0x32c   : > { %p996_p10 = scmp.lt.u32.totalorder %s994_s27, %s990_s17  ;;  %p998_p2 = scmp.lt.u32.totalorder %s990_s17, %s1257_s25 }
 0x32d   : > { %p992_p0 = pnand %p991_p1, %p1320_p9 }
 0x32e   : > { %p997_p12 = por %p996_p10, %p995_p6 }
 0x32f   : > { %p993_p5 = pneg %p992_p0 }
 0x330   : > { %p999_p3 = por %p998_p2, %p997_p12 }
 0x332   : > { %p1000_p4 = pnand %p999_p3, %p993_p5 }
 0x334   : > { %1003 = shalt.err (!%p1000_p4)
}
 0x335   : > { %850 = dma.vmem_to_hbm [thread:$0]  (%p1320_p9), %s1259_s14, 32, %s1257_s25, %s643_s13  }
 0x336 PF: > { %p867_p7 = scmp.ge.s32.totalorder %s1046_s12, 2  ;;  %s686_s29 = sand.u32 1, %s1034_s30  }
 0x337   : > { %p1321_p8 = scmp.ne.s32.totalorder %s1314_s20, 0  ;;  %s687_s16 = scalar_lea.sflag [#allocation4], %s686_s29 }
 0x339   : > { %p859_p11 = pnand %p867_p7, %p1321_p8 }
 0x33b   : > { %1025 = dma.done.wait (!%p859_p11), %s687_s16, 32  }
 0x33c   : > { %1027 = vsyncadd (!%p859_p11), %s687_s16, 4294967264  ;;  %s696_s21 = scalar_lea.sflag [#allocation7], %s686_s29 }
 0x33d   : > { %1029 = dma.done.wait (!%p859_p11), %s696_s21, 64  }
 0x33e   : > { %1031 = vsyncadd (!%p859_p11), %s696_s21, 4294967232  ;;  %p24_p9 = scmp.ge.s32.totalorder %s1131_s15, 4   ;;  %s1322_s30 = smov %s1038_s10 }
 0x33f   : > { %s1323_s10 = smov %s1042_s11  ;;  %s1324_s11 = smov %s1142_s18 }
 0x340   : > { %s1325_s12 = smov %s1131_s15  ;;  %26 = sbr.rel (!%p24_p9) target bundleno = 6 (0x6), region = 112 }
 0x347   :  { %701 = vsyncpa [#allocation3], 1 }
 0x348   :  { %703 = vsyncpa [#allocation3 + $0x1], 1 }
 0x349   :  { %704 = vsyncpa [#allocation4], 1 }
 0x34a   :  { %706 = vsyncpa [#allocation4 + $0x1], 1 }
 0x34b   :  { %707 = vsyncpa [#allocation7], 1 }
 0x34c   :  { %709 = vsyncpa [#allocation7 + $0x1], 1 }

</bundles_post_ra>
